<compile_context>
chip_gen: v7x
topology: tpu7x:2x2x1
jax: 0.10.0
libtpu: 0.0.40
codegen_flags: <defaults>
</compile_context>

<pallas_src>
import functools

import numpy as np
import jax
import jax.numpy as jnp
from jax.experimental import pallas as pl
from jax.experimental.pallas import tpu as pltpu


def _round_up(n, m):
    return ((n + m - 1) // m) * m


# ----------------------------- static configuration ------------------------------------
def build_cfg(latent_shape, start_shape, channels, strides):
    C0, H0, W0 = start_shape
    lane_block = _round_up(H0 * W0, 128)   # per-channel lane block of the linear output
    cin0_pad = _round_up(C0, 8)
    layers = []
    # layer-0 source: raw start grid, one 128-lane block per channel
    src = dict(h=H0, w=W0, stride=W0, off=0, npx_pad=lane_block, c=C0, c_pad=cin0_pad)
    for i, (c, s) in enumerate(zip(channels, strides)):
        ho, wo = src["h"] * s, src["w"] * s
        hp, wp = ho + 2, wo + 2                    # zero-border padded output grid
        npx = hp * wp
        npx_pad = _round_up(npx, 128)              # lane axis padded to full vregs
        cout_pad = _round_up(c, 8)
        layers.append(dict(
            cin=src["c"], cin_pad=src["c_pad"], cout=c, cout_pad=cout_pad, s=s,
            ho=ho, wo=wo, hp=hp, wp=wp, hw=ho * wo, npx=npx, npx_pad=npx_pad,
            src_h=src["h"], src_w=src["w"], src_stride=src["stride"],
            src_off=src["off"], src_npx_pad=src["npx_pad"],
            is_last=(i == len(channels) - 1)))
        src = dict(h=ho, w=wo, stride=wp, off=wp + 1, npx_pad=npx_pad,
                   c=c, c_pad=cout_pad)
    return dict(L=int(np.prod(latent_shape)), C0=C0, H0=H0, W0=W0,
                lane_block=lane_block, cin0_pad=cin0_pad, layers=layers)


def _make_upsample_matrix(src_h, src_w, src_stride, src_off, src_npx_pad,
                          stride, dst_wp, dst_npx_pad):
    """0/1 matrix scattering the source grid onto the dilated, asymmetrically padded
    (top/left=1, bottom/right=stride) flattened destination grid."""
    U = np.zeros((src_npx_pad, dst_npx_pad), np.float32)
    for y in range(src_h):
        for x in range(src_w):
            p = src_off + y * src_stride + x
            q = (1 + y * stride) * dst_wp + (1 + x * stride)
            U[p, q] = 1.0
    return U


def _make_interior_mask(hp, wp, npx_pad):
    g = np.zeros((hp, wp), np.float32)
    g[1:-1, 1:-1] = 1.0
    m = np.zeros((1, npx_pad), np.float32)
    m[0, :hp * wp] = g.reshape(-1)
    return m


# --------------------------------- parameter init --------------------------------------
def init_params(key, latent_shape, start_shape, channels):
    """PyTorch-layout parameters (as nn.Module would hold them)."""
    C0 = start_shape[0]
    L = int(np.prod(latent_shape))
    P = int(np.prod(start_shape))
    keys = jax.random.split(key, 2 + 6 * len(channels))
    ki = iter(range(len(keys)))

    params = {
        "lin_w": 0.1 * jax.random.normal(keys[next(ki)], (L, P), jnp.float32),
        "lin_b": 0.1 * jax.random.normal(keys[next(ki)], (P,), jnp.float32),
        "layers": [],
    }
    ech = C0
    for c in channels:
        layer = {
            # ConvTranspose2d weight, PyTorch layout (Cin, Cout, kh, kw)
            "wt": 0.1 * jax.random.normal(keys[next(ki)], (ech, c, 3, 3), jnp.float32),
            "bt": 0.1 * jax.random.normal(keys[next(ki)], (c,), jnp.float32),
            # ResidualUnit Conv2d weights, PyTorch layout (Cout, Cin, kh, kw)
            "w0": 0.1 * jax.random.normal(keys[next(ki)], (c, c, 3, 3), jnp.float32),
            "b0": 0.1 * jax.random.normal(keys[next(ki)], (c,), jnp.float32),
            "a0": jnp.full((1,), 0.25, jnp.float32),   # PReLU default init
            "w1": 0.1 * jax.random.normal(keys[next(ki)], (c, c, 3, 3), jnp.float32),
            "b1": 0.1 * jax.random.normal(keys[next(ki)], (c,), jnp.float32),
            "a1": jnp.full((1,), 0.25, jnp.float32),
        }
        params["layers"].append(layer)
        ech = c
    return params


def pack_params(params, cfg):
    """One-time hoisting of all weight flips / transposes / channel padding / bf16 casts
    plus the constant scatter / mask matrices."""
    L, C0, H0, W0 = cfg["L"], cfg["C0"], cfg["H0"], cfg["W0"]
    HW0 = H0 * W0
    blk, cin0_pad = cfg["lane_block"], cfg["cin0_pad"]

    # Linear weights packed so channel c occupies lanes [c*blk, c*blk + HW0)  (item 9).
    lw = params["lin_w"].reshape(L, C0, HW0)
    lin_w = jnp.zeros((L, cin0_pad, blk), jnp.float32).at[:, :C0, :HW0].set(lw)
    lin_w = lin_w.reshape(L, cin0_pad * blk)
    lb = params["lin_b"].reshape(C0, HW0)
    lin_b = jnp.zeros((1, cin0_pad, blk), jnp.float32).at[0, :C0, :HW0].set(lb)
    lin_b = lin_b.reshape(1, cin0_pad * blk)

    packed = {"lin_w": lin_w, "lin_b": lin_b, "layers": []}
    alphas = []
    for lay, p in zip(cfg["layers"], params["layers"]):
        cin, cin_pad = lay["cin"], lay["cin_pad"]
        cout, cout_pad = lay["cout"], lay["cout_pad"]
        wp, npx_pad = lay["wp"], lay["npx_pad"]

        # ConvTranspose2d == correlation with spatially flipped, Cin/Cout-swapped weight.
        wt_flip = p["wt"][:, :, ::-1, ::-1]                       # (cin, cout, 3, 3)
        wt_taps = jnp.transpose(wt_flip, (2, 3, 1, 0)).reshape(9, cout, cin)
        wt_taps = (jnp.zeros((9, cout_pad, cin_pad), jnp.float32)
                   .at[:, :cout, :cin].set(wt_taps))

        def conv_taps(w):                                         # (cout, cin=cout, 3, 3)
            t = jnp.transpose(w, (2, 3, 0, 1)).reshape(9, cout, cout)
            return (jnp.zeros((9, cout_pad, cout_pad), jnp.float32)
                    .at[:, :cout, :cout].set(t))

        wr_taps = jnp.stack([conv_taps(p["w0"]), conv_taps(p["w1"])])  # (2,9,cp,cp)

        def pad_bias(b):
            return jnp.zeros((cout_pad,), jnp.float32).at[:cout].set(b)

        biases = jnp.stack([pad_bias(p["bt"]), pad_bias(p["b0"]),
                            pad_bias(p["b1"])]).reshape(3, cout_pad, 1)

        U = _make_upsample_matrix(lay["src_h"], lay["src_w"], lay["src_stride"],
                                  lay["src_off"], lay["src_npx_pad"], lay["s"],
                                  wp, npx_pad)

        packed["layers"].append(dict(
            U=jnp.asarray(U).astype(jnp.bfloat16),                # 0/1 -> lossless bf16
            Wt=wt_taps.astype(jnp.bfloat16),
            Wr=wr_taps.astype(jnp.bfloat16),
            b=biases,
            mask=jnp.asarray(_make_interior_mask(lay["hp"], wp, npx_pad)),
        ))
        alphas += [p["a0"][0], p["a1"][0]]
    packed["alphas"] = jnp.stack(alphas).astype(jnp.float32)
    return packed


# --------------------------------- fused kernel ----------------------------------------
def _make_generator_kernel(cfg, roll_like_jnp):
    n_layers = len(cfg["layers"])
    cin0_pad, blk = cfg["cin0_pad"], cfg["lane_block"]

    def lane_shift(xf, delta, npx):
        """Cyclic lane shift so that out[:, p] == xf[:, p + delta] for every lane whose
        source index stays in range; wrap-around only reaches border/pad lanes, which
        the caller masks/crops.  Non-negative shifts only."""
        shift = ((-delta) % npx) if roll_like_jnp else (delta % npx)
        return xf if shift == 0 else pltpu.roll(xf, shift, axis=1)

    def conv3x3(xf, get_w, bias, wp, npx):
        """'same' 3x3 conv on a flattened zero-bordered (cin, npx) image as 9
        accumulating (cout,cin)x(cin,npx) bf16 matmuls on lane-rolled inputs."""
        acc = None
        for kh in range(3):
            for kw in range(3):
                tap = lane_shift(xf, (kh - 1) * wp + (kw - 1), npx)
                term = jnp.dot(get_w(kh * 3 + kw), tap.astype(jnp.bfloat16),
                               preferred_element_type=jnp.float32)
                acc = term if acc is None else acc + term
        return acc + bias                                          # bias (cout, 1)

    def inorm(y, mask, count):
        # y already has a zero border/pad, so full-lane sums == interior sums.
        inv = 1.0 / float(count)
        mean = jnp.sum(y, axis=1, keepdims=True) * inv
        cent = (y - mean) * mask
        var = jnp.sum(cent * cent, axis=1, keepdims=True) * inv
        return cent * jax.lax.rsqrt(var + 1e-5)

    def kernel(*refs):
        it = iter(refs)
        x_ref, lw_ref, lb_ref, alpha_ref = (next(it) for _ in range(4))
        layer_refs = [tuple(next(it) for _ in range(5)) for _ in range(n_layers)]
        out_ref = next(it)

        # ---- Flatten -> Linear -> lane-aligned reshape to (cin0_pad, lane_block) ------
        lin = jnp.dot(x_ref[0], lw_ref[...], preferred_element_type=jnp.float32)
        lin0 = lin[0:1, :] + lb_ref[...]                           # row 0 = the sample
        xcur = jnp.concatenate([lin0[:, c * blk:(c + 1) * blk]
                                for c in range(cin0_pad)], axis=0)  # (cin0_pad, blk)

        # ---- conv layers ----------------------------------------------------------------
        for li, lay in enumerate(cfg["layers"]):
            U_ref, wt_ref, wr_ref, b_ref, m_ref = layer_refs[li]
            wp, npx = lay["wp"], lay["npx_pad"]
            mask = m_ref[...]                                      # (1, npx) interior mask

            # transposed-conv dilation + asymmetric pad: one 0/1 scatter matmul
            xup = jnp.dot(xcur.astype(jnp.bfloat16), U_ref[...],
                          preferred_element_type=jnp.float32)      # (cin_pad, npx)

            # transposed convolution (conv only)
            y = conv3x3(xup, lambda k: wt_ref[k], b_ref[0], wp, npx) * mask
            res = y

            # residual subunit 0: Conv -> InstanceNorm -> PReLU
            y = conv3x3(y, lambda k: wr_ref[0, k], b_ref[1], wp, npx) * mask
            y = inorm(y, mask, lay["hw"])
            y = jnp.where(y >= 0, y, alpha_ref[2 * li] * y)

            # residual subunit 1: Conv (-> InstanceNorm -> PReLU unless last layer)
            y = conv3x3(y, lambda k: wr_ref[1, k], b_ref[2], wp, npx)
            if not lay["is_last"]:
                y = y * mask
                y = inorm(y, mask, lay["hw"])
                y = jnp.where(y >= 0, y, alpha_ref[2 * li + 1] * y)
            # else: border/pad lanes are cropped in the epilogue -> skip the dead mask.

            xcur = y + res                                         # identity residual

        out_ref[0] = xcur.astype(out_ref.dtype)

    return kernel


# ----------------------------------- forward pass --------------------------------------
def generator_forward(packed, x, cfg, roll_like_jnp=True):
    B = x.shape[0]
    L = cfg["L"]
    # pad the batch row to 8 sublanes so the Linear matmul has an MXU-friendly M
    x2 = jnp.zeros((B, 8, L), jnp.float32).at[:, 0, :].set(
        x.reshape(B, L).astype(jnp.float32))
    last = cfg["layers"][-1]
    c_last, cp_last = last["cout"], last["cout_pad"]
    npx_pad, hp, wp = last["npx_pad"], last["hp"], last["wp"]

    def full_spec(a):
        zeros = (0,) * a.ndim
        return pl.BlockSpec(a.shape, lambda b: zeros)

    args = [x2, packed["lin_w"], packed["lin_b"], packed["alphas"]]
    in_specs = [
        pl.BlockSpec((1, 8, L), lambda b: (b, 0, 0)),
        full_spec(packed["lin_w"]),
        full_spec(packed["lin_b"]),
        pl.BlockSpec(memory_space=pltpu.MemorySpace.SMEM),         # PReLU slopes (scalars)
    ]
    for lp in packed["layers"]:
        for name in ("U", "Wt", "Wr", "b", "mask"):
            args.append(lp[name])
            in_specs.append(full_spec(lp[name]))

    out_flat = pl.pallas_call(
        _make_generator_kernel(cfg, roll_like_jnp),
        grid=(B,),
        in_specs=in_specs,
        out_specs=pl.BlockSpec((1, cp_last, npx_pad), lambda b: (b, 0, 0)),
        out_shape=jax.ShapeDtypeStruct((B, cp_last, npx_pad), jnp.float32),
        compiler_params=pltpu.CompilerParams(dimension_semantics=("parallel",)),
    )(*args)

    # lane-dense kernel output is the zero-bordered padded grid; crop to NCHW here.
    out = out_flat[:, :c_last, :hp * wp].reshape(B, c_last, hp, wp)[:, :, 1:-1, 1:-1]
    return out
    # TODO(synk): dropout is None in this configuration; no dropout branch implemented.


# ----------------------- roll-convention probe (trace-time constant) -------------------
def _pltpu_roll_matches_jnp():
    """pltpu.roll is expected to match jnp.roll (out[i] = in[(i - shift) % N]); probe it
    once so the 3x3 tap pairing above can never be silently mirrored."""
    def k(x_ref, o_ref):
        o_ref[...] = pltpu.roll(x_ref[...], 3, axis=1)

    x = jnp.arange(8 * 128, dtype=jnp.float32).reshape(8, 128)
    y = pl.pallas_call(k, out_shape=jax.ShapeDtypeStruct((8, 128), jnp.float32))(x)
    return bool(jnp.array_equal(y, jnp.roll(x, 3, axis=1)))


# ------------------------------ plain-JAX reference ------------------------------------
def _ref_forward(params, x, start_shape, strides):
    B = x.shape[0]
    C0, H0, W0 = start_shape
    h = jnp.dot(x.reshape(B, -1), params["lin_w"]) + params["lin_b"]
    h = h.reshape(B, C0, H0, W0)
    n = len(params["layers"])
    for i, p in enumerate(params["layers"]):
        s = strides[i]
        is_last = i == n - 1
        Bc, C, H, W = h.shape
        hd = jnp.zeros((Bc, C, (H - 1) * s + 1, (W - 1) * s + 1), h.dtype)
        hd = hd.at[:, :, ::s, ::s].set(h)
        hd = jnp.pad(hd, ((0, 0), (0, 0), (1, s), (1, s)))
        w_eq = jnp.transpose(p["wt"][:, :, ::-1, ::-1], (1, 0, 2, 3))
        h = jax.lax.conv_general_dilated(
            hd, w_eq, (1, 1), "VALID",
            dimension_numbers=("NCHW", "OIHW", "NCHW")) + p["bt"][None, :, None, None]
        res = h

        def sub(hh, w, b, a, do_na):
            hp_ = jnp.pad(hh, ((0, 0), (0, 0), (1, 1), (1, 1)))
            y = jax.lax.conv_general_dilated(
                hp_, w, (1, 1), "VALID",
                dimension_numbers=("NCHW", "OIHW", "NCHW")) + b[None, :, None, None]
            if do_na:
                mean = jnp.mean(y, axis=(2, 3), keepdims=True)
                var = jnp.mean((y - mean) ** 2, axis=(2, 3), keepdims=True)
                y = (y - mean) * jax.lax.rsqrt(var + 1e-5)
                y = jnp.where(y >= 0, y, a * y)
            return y

        h = sub(h, p["w0"], p["b0"], p["a0"][0], True)
        h = sub(h, p["w1"], p["b1"], p["a1"][0], not is_last)
        h = h + res
    return h


# ---------------------------------------- main ------------------------------------------
if __name__ == "__main__":
    latent_shape = (6, 4)          # latent vector shape (minus batch dim)
    start_shape = (4, 8, 8)        # (in_channels, H, W)
    channels = (8, 1)
    strides = (2, 2)               # output spatial = 8 * 2 * 2 = 32
    B = 2

    cfg = build_cfg(latent_shape, start_shape, channels, strides)
    key = jax.random.PRNGKey(0)
    k_param, k_x = jax.random.split(key)
    params = init_params(k_param, latent_shape, start_shape, channels)
    packed = pack_params(params, cfg)
    x = jax.random.normal(k_x, (B,) + latent_shape, jnp.float32)

    roll_like_jnp = _pltpu_roll_matches_jnp()
    fwd = jax.jit(functools.partial(generator_forward, cfg=cfg,
                                    roll_like_jnp=roll_like_jnp))
    out = jax.block_until_ready(fwd(packed, x))

    ref = jax.block_until_ready(_ref_forward(params, x, start_shape, strides))

    assert out.shape == (B, channels[-1], 32, 32), out.shape
    assert bool(jnp.all(jnp.isfinite(out)))
    err = float(jnp.max(jnp.abs(out - ref)))
    scale = float(jnp.max(jnp.abs(ref)))
    # bf16 MXU operands (conv weights / scatter matrix + activation casts) bound the
    # mismatch vs. the all-f32 reference; structural bugs would show up as O(scale).
    assert err <= 1e-3 + 3e-2 * scale, (err, scale)
    print("KERNEL_OK")
</pallas_src>

<mosaic_0001>
module attributes {stable_mosaic.version = 11 : i64} {
  func.func @k(%arg0: memref<8x128xf32, #tpu.memory_space<vmem>>, %arg1: memref<8x128xf32, #tpu.memory_space<vmem>>) attributes {dimension_semantics = [], scalar_prefetch = 0 : i64, scratch_operands = 0 : i64, tpu.core_type = #tpu.core_type<tc>} {
    %c0 = arith.constant 0 : index
    %c0_0 = arith.constant 0 : index
    %0 = vector.load %arg0[%c0, %c0_0] : memref<8x128xf32, #tpu.memory_space<vmem>>, vector<8x128xf32>
    %c3_i32 = arith.constant 3 : i32
    %1 = tpu.dynamic_rotate %0 by %c3_i32 dim 1 : vector<8x128xf32>, i32 -> vector<8x128xf32>
    %c0_1 = arith.constant 0 : index
    %c0_2 = arith.constant 0 : index
    %2 = vector.load %arg1[%c0_1, %c0_2] : memref<8x128xf32, #tpu.memory_space<vmem>>, vector<8x128xf32>
    tpu.vector_store %arg1[%c0_1, %c0_2], %1 {strides = array<i32>} : memref<8x128xf32, #tpu.memory_space<vmem>>, vector<8x128xf32>,
    return
  }
}

</mosaic_0001>

<bundles_post_ra>
// kernel: tpu_custom_call.1
= control target key start
LH: loop header
LB: loop body
LE: loop exit
PB: predicated region body
PF: predicated region fallthrough
CT: control target
= control target key end

     0   :  { %6 = vsyncpa [#allocation3], 0  ;;  %s128_s0 = inlined_call_operand.hbm [shape: f32[8,128], index: 0, kind: input, shape index: {}]   ;;  %s129_s1 = inlined_call_operand.hbm [shape: f32[8,128], index: 1, kind: output, shape index: {}]  }
   0x1   :  { %7 = vsyncpa [#allocation4], 0  ;;  %s91_s6 = smov [#allocation2]   ;;  %s43_s10 = scalar_lea.hbm %s128_s0, 128 }
   0x2   :  { %s14_s7 = sshll.u32 %s91_s6, 4  ;;  %p44_p0 = scmp.ne.s32.totalorder %s128_s0, %s43_s10  ;;  %s15_s7 = int_to_ptr.vmem [resolvable:$true] %s14_s7 }
   0x3   :  { %p47_p1 = scmp.lt.u32.totalorder %s43_s10, %s128_s0 }
   0x5   :  { %p49_p2 = pnand %p47_p1, %p44_p0 }
   0x7   :  { %52 = shalt.err (!%p49_p2)
}
   0x8   :  { %s53_s15 = scalar_lea.vmem %s15_s7, 128  ;;  %p58_p4 = scmp.lt.s32.totalorder %s15_s7, %s15_s7 }
   0x9   :  { %p54_p3 = scmp.ne.s32.totalorder %s15_s7, %s53_s15  ;;  %p59_p5 = scmp.lt.s32.totalorder %s53_s15, %s53_s15 }
   0xb   :  { %p60_p6 = por %p59_p5, %p58_p4 }
   0xd   :  { %p61_p7 = pnand %p60_p6, %p54_p3 }
   0xf   :  { %64 = shalt.err (!%p61_p7)
}
  0x10   :  { %17 = dma.hbm_to_vmem [thread:$0]  %s128_s0, 128, %s15_s7, [#allocation3]  }
  0x11   :  { %87 = dma.done.wait [#allocation3], 128  }
  0x12   :  { %88 = vsyncadd [#allocation3], 4294967168  ;;  %v21_v0 = vld [vmem:[#allocation2] sm:$0xff]  ;;  %s92_s18 = smov 3   ;;  %s93_s19 = smov [#allocation5]  }
  0x13   :  { %22 = vrot.lane.b32.xlu0 %v21_v0, %s92_s18  ;;  %s31_s20 = sshll.u32 %s93_s19, 4  ;;  %s32_s20 = int_to_ptr.vmem [resolvable:$true] %s31_s20 }
  0x14   :  { %s65_s21 = scalar_lea.vmem %s32_s20, 128  ;;  %p70_p9 = scmp.lt.s32.totalorder %s32_s20, %s32_s20 }
  0x15   :  { %p66_p8 = scmp.ne.s32.totalorder %s32_s20, %s65_s21  ;;  %p71_p10 = scmp.lt.s32.totalorder %s65_s21, %s65_s21 }
  0x17   :  { %p72_p11 = por %p71_p10, %p70_p9 }
  0x19   :  { %p73_p12 = pnand %p72_p11, %p66_p8 }
  0x85   :  { %v23_v1 = vpop.permute.xlu0 %22 }
  0x86   :  { %24 = vst [vmem:[#allocation5] sm:$0xff] %v23_v1 }
  0x87   :  { %76 = shalt.err (!%p73_p12)
}
  0x88   :  { %s77_s0 = scalar_lea.hbm %s129_s1, 128 }
  0x89   :  { %p78_p13 = scmp.ne.s32.totalorder %s129_s1, %s77_s0  ;;  %p81_p0 = scmp.lt.u32.totalorder %s77_s0, %s129_s1 }
  0x8b   :  { %p83_p1 = pnand %p81_p0, %p78_p13 }
  0x8d   :  { %86 = shalt.err (!%p83_p1)
}
  0x8e   :  { %34 = dma.vmem_to_hbm [thread:$0]  %s32_s20, 128, %s129_s1, [#allocation4]  }
  0x8f   :  { %89 = dma.done.wait [#allocation4], 128  }
  0x90   :  { %90 = vsyncadd [#allocation4], 4294967168 }
  0x91   :  { %38 = vsyncpa [#allocation3], 1 }
  0x92   :  { %39 = vsyncpa [#allocation4], 1 }

</bundles_post_ra>
